<compile_context>
chip_gen: v6e
topology: v6e:2x2x1
jax: 0.10.0
libtpu: 0.0.40
codegen_flags: <defaults>
</compile_context>

<pallas_src>
import functools
import math

import jax
import jax.numpy as jnp
from jax import lax
from jax.experimental import pallas as pl
from jax.experimental.pallas import tpu as pltpu

_VMEM_LIMIT = 48 * 1024 * 1024  # fits v7x's 64 MiB/TC with headroom


# --------------------------------------------------------------------------
# Linear: y = x @ W + b, tiled over rows, weights resident in VMEM.
# --------------------------------------------------------------------------
def _linear_kernel(x_ref, w_ref, b_ref, o_ref):
    x = x_ref[...]                                            # (tm, d_in)
    y = jnp.dot(x, w_ref[...], preferred_element_type=jnp.float32)
    y = y + b_ref[...]                                        # bias in f32
    o_ref[...] = y.astype(o_ref.dtype)                        # single downcast


def linear(x2, w, b, *, tm=256):
    """x2: [N, d_in]; w: [d_in, d_out] (pre-transposed vs torch); b: [d_out]."""
    n, d_in = x2.shape
    d_out = w.shape[1]
    n_tiles = pl.cdiv(n, tm)
    n_pad = n_tiles * tm
    if n_pad != n:                                            # pad instead of assert
        x2 = jnp.pad(x2, ((0, n_pad - n), (0, 0)))

    out = pl.pallas_call(
        _linear_kernel,
        out_shape=jax.ShapeDtypeStruct((n_pad, d_out), x2.dtype),
        grid_spec=pltpu.PrefetchScalarGridSpec(
            num_scalar_prefetch=0,
            grid=(n_tiles,),
            in_specs=[
                pl.BlockSpec((tm, d_in), lambda i: (i, 0)),       # x rows
                pl.BlockSpec((d_in, d_out), lambda i: (0, 0)),    # W (resident)
                pl.BlockSpec((1, d_out), lambda i: (0, 0)),       # b (resident)
            ],
            out_specs=pl.BlockSpec((tm, d_out), lambda i: (i, 0)),
        ),
        compiler_params=pltpu.CompilerParams(
            dimension_semantics=("parallel",),
            vmem_limit_bytes=_VMEM_LIMIT,
        ),
    )(x2, w, b.reshape(1, d_out))
    return out[:n] if n_pad != n else out


# --------------------------------------------------------------------------
# Scaled dot-product attention, one (batch, head) pair per grid step.
# --------------------------------------------------------------------------
def _sdpa_kernel(q_ref, k_ref, v_ref, m_ref, o_ref, *, scale):
    q = q_ref[...]                                            # (Sq, d_k)
    k = k_ref[...]                                            # (Sk, d_k)
    v = v_ref[...]                                            # (Sk, d_k)
    msk = m_ref[...]                                          # (Sq, Sk) int32

    # q @ k^T without materializing a transpose (contraction over d_k).
    s = lax.dot_general(q, k, (((1,), (1,)), ((), ())),
                        preferred_element_type=jnp.float32) * scale
    s = jnp.where(msk == 0, -1e9, s)                          # masked_fill(mask==0, -1e9)

    # numerically stable softmax along the key axis (f32 throughout)
    s_max = jnp.max(s, axis=-1, keepdims=True)
    p = jnp.exp(s - s_max)
    p = p / jnp.sum(p, axis=-1, keepdims=True)

    o = jnp.dot(p.astype(v.dtype), v, preferred_element_type=jnp.float32)
    o_ref[...] = o.astype(o_ref.dtype)


# --------------------------------------------------------------------------
# Full MultiHeadedAttention forward.
# --------------------------------------------------------------------------
def multi_headed_attention(query, key, value, params, h, mask=None, *, tm=256):
    """
    query/key/value: [B, S, d_model]
    params: ((wq,bq),(wk,bk),(wv,bv),(wo,bo)) with w: [d_model, d_model]
    mask: [B, Sq, Sk] (broadcast over heads, as in the torch module) or None.
    """
    (wq, bq), (wk, bk), (wv, bv), (wo, bo) = params
    B, Sq, d_model = query.shape
    Sk = key.shape[1]
    assert d_model % h == 0
    d_k = d_model // h

    # Q/K/V projections (row-tiled linear kernel, weights resident)
    q = linear(query.reshape(B * Sq, d_model), wq, bq, tm=tm)
    k = linear(key.reshape(B * Sk, d_model), wk, bk, tm=tm)
    v = linear(value.reshape(B * Sk, d_model), wv, bv, tm=tm)

    # [B, S, h, d_k] -> [B, h, S, d_k]
    q = q.reshape(B, Sq, h, d_k).transpose(0, 2, 1, 3)
    k = k.reshape(B, Sk, h, d_k).transpose(0, 2, 1, 3)
    v = v.reshape(B, Sk, h, d_k).transpose(0, 2, 1, 3)

    if mask is None:
        mask4 = jnp.ones((B, 1, Sq, Sk), jnp.int32)
    else:
        mask4 = mask.reshape(B, 1, Sq, Sk).astype(jnp.int32)

    scale = 1.0 / math.sqrt(d_k)
    attn_out = pl.pallas_call(
        functools.partial(_sdpa_kernel, scale=scale),
        out_shape=jax.ShapeDtypeStruct((B, h, Sq, d_k), query.dtype),
        grid_spec=pltpu.PrefetchScalarGridSpec(
            num_scalar_prefetch=0,
            grid=(B, h),
            in_specs=[
                pl.BlockSpec((None, None, Sq, d_k), lambda b, hh: (b, hh, 0, 0)),
                pl.BlockSpec((None, None, Sk, d_k), lambda b, hh: (b, hh, 0, 0)),
                pl.BlockSpec((None, None, Sk, d_k), lambda b, hh: (b, hh, 0, 0)),
                pl.BlockSpec((None, None, Sq, Sk), lambda b, hh: (b, 0, 0, 0)),
            ],
            out_specs=pl.BlockSpec((None, None, Sq, d_k),
                                   lambda b, hh: (b, hh, 0, 0)),
        ),
        compiler_params=pltpu.CompilerParams(
            dimension_semantics=("parallel", "parallel"),
            vmem_limit_bytes=_VMEM_LIMIT,
        ),
    )(q, k, v, mask4)

    # concat heads: [B, h, Sq, d_k] -> [B*Sq, d_model], then output projection
    x = attn_out.transpose(0, 2, 1, 3).reshape(B * Sq, d_model)
    out = linear(x, wo, bo, tm=tm)
    return out.reshape(B, Sq, d_model)


# --------------------------------------------------------------------------
# Params init (mimics torch.nn.Linear default: uniform ±1/sqrt(fan_in)).
# Weights stored pre-transposed as [in, out] for row-major matmul.
# --------------------------------------------------------------------------
def init_params(key, d_model, dtype=jnp.float32):
    ks = jax.random.split(key, 8)
    bound = 1.0 / math.sqrt(d_model)

    def lin(kw, kb):
        w = jax.random.uniform(kw, (d_model, d_model), dtype, -bound, bound)
        b = jax.random.uniform(kb, (d_model,), dtype, -bound, bound)
        return w, b

    return tuple(lin(ks[2 * i], ks[2 * i + 1]) for i in range(4))


# --------------------------------------------------------------------------
# Pure-JAX reference (high-precision matmuls) for correctness checking.
# --------------------------------------------------------------------------
def ref_mha(query, key, value, params, h, mask):
    (wq, bq), (wk, bk), (wv, bv), (wo, bo) = params
    B, Sq, d_model = query.shape
    Sk = key.shape[1]
    d_k = d_model // h
    hp = jax.lax.Precision.HIGHEST

    def proj(x, w, b):
        return jnp.dot(x, w, precision=hp) + b

    q = proj(query, wq, bq).reshape(B, Sq, h, d_k).transpose(0, 2, 1, 3)
    k = proj(key, wk, bk).reshape(B, Sk, h, d_k).transpose(0, 2, 1, 3)
    v = proj(value, wv, bv).reshape(B, Sk, h, d_k).transpose(0, 2, 1, 3)

    scores = jnp.einsum("bhqd,bhkd->bhqk", q, k, precision=hp) / math.sqrt(d_k)
    scores = jnp.where(mask[:, None, :, :] == 0, -1e9, scores)
    p = jax.nn.softmax(scores, axis=-1)
    x = jnp.einsum("bhqk,bhkd->bhqd", p, v, precision=hp)
    x = x.transpose(0, 2, 1, 3).reshape(B, Sq, d_model)
    return proj(x, wo, bo)


if __name__ == "__main__":
    # Small but lane-dense shapes: d_model=256 (multiple of 128), d_k=128,
    # seq=128, so all kernel tiles are (8,128)-aligned and stores are unmasked.
    B, S, d_model, h = 2, 128, 256, 2

    root = jax.random.PRNGKey(0)
    kq, kk, kv, kp = jax.random.split(root, 4)
    query = jax.random.normal(kq, (B, S, d_model), jnp.float32)
    key_in = jax.random.normal(kk, (B, S, d_model), jnp.float32)
    value = jax.random.normal(kv, (B, S, d_model), jnp.float32)
    params = init_params(kp, d_model)

    # causal mask (mask==0 positions are blocked), broadcast over heads
    mask = jnp.broadcast_to(jnp.tril(jnp.ones((S, S), jnp.int32)), (B, S, S))

    y = multi_headed_attention(query, key_in, value, params, h, mask=mask)
    y = jax.block_until_ready(y)

    y_ref = ref_mha(query, key_in, value, params, h, mask)
    assert y.shape == (B, S, d_model)
    err = float(jnp.max(jnp.abs(y - y_ref)))
    assert jnp.allclose(y, y_ref, atol=2e-3, rtol=2e-3), f"max abs err {err}"

    print("KERNEL_OK")
</pallas_src>

<mosaic_0001>
module attributes {stable_mosaic.version = 11 : i64} {
  func.func @_linear_kernel(%arg0: i32, %arg1: memref<256x256xf32, #tpu.memory_space<vmem>>, %arg2: memref<256x256xf32, #tpu.memory_space<vmem>>, %arg3: memref<1x256xf32, #tpu.memory_space<vmem>>, %arg4: memref<256x256xf32, #tpu.memory_space<vmem>>) attributes {dimension_semantics = [#tpu.dimension_semantics<parallel>], iteration_bounds = array<i64: 1>, scalar_prefetch = 0 : i64, scratch_operands = 0 : i64, tpu.core_type = #tpu.core_type<tc>, window_params = [{transform_indices = @transform_0, window_bounds = array<i64: 256, 256>}, {pipeline_mode = #tpu.pipeline_mode<synchronous>, transform_indices = @transform_1, window_bounds = array<i64: 256, 256>}, {pipeline_mode = #tpu.pipeline_mode<synchronous>, transform_indices = @transform_2, window_bounds = array<i64: 1, 256>}, {transform_indices = @transform_3, window_bounds = array<i64: 256, 256>}]} {
    %c0 = arith.constant 0 : index
    %c0_0 = arith.constant 0 : index
    %0 = vector.load %arg1[%c0, %c0_0] : memref<256x256xf32, #tpu.memory_space<vmem>>, vector<256x256xf32>
    %c0_1 = arith.constant 0 : index
    %c0_2 = arith.constant 0 : index
    %1 = vector.load %arg2[%c0_1, %c0_2] : memref<256x256xf32, #tpu.memory_space<vmem>>, vector<256x256xf32>
    %cst = arith.constant dense<0.000000e+00> : vector<256x256xf32>
    %2 = tpu.matmul %0, %1, %cst {dimension_numbers = #tpu.dot_dimension_numbers<[1], [0], [0], [1], [0, 0, 1, 1], [], []>} : vector<256x256xf32>, vector<256x256xf32>, vector<256x256xf32> -> vector<256x256xf32>
    %c0_3 = arith.constant 0 : index
    %c0_4 = arith.constant 0 : index
    %3 = vector.load %arg3[%c0_3, %c0_4] : memref<1x256xf32, #tpu.memory_space<vmem>>, vector<1x256xf32>
    %4 = vector.broadcast %3 : vector<1x256xf32> to vector<256x256xf32>
    %5 = arith.addf %2, %4 : vector<256x256xf32>
    %c0_5 = arith.constant 0 : index
    %c0_6 = arith.constant 0 : index
    %6 = vector.load %arg4[%c0_5, %c0_6] : memref<256x256xf32, #tpu.memory_space<vmem>>, vector<256x256xf32>
    tpu.vector_store %arg4[%c0_5, %c0_6], %5 {strides = array<i32>} : memref<256x256xf32, #tpu.memory_space<vmem>>, vector<256x256xf32>,
    return
  }
  func.func @transform_0(%arg0: i32) -> (i32, i32) {
    %c0_i32 = arith.constant 0 : i32
    %c0_i32_0 = arith.constant 0 : i32
    return %arg0, %c0_i32 : i32, i32
  }
  func.func @transform_1(%arg0: i32) -> (i32, i32) {
    %c0_i32 = arith.constant 0 : i32
    %c0_i32_0 = arith.constant 0 : i32
    %c0_i32_1 = arith.constant 0 : i32
    return %c0_i32, %c0_i32_0 : i32, i32
  }
  func.func @transform_2(%arg0: i32) -> (i32, i32) {
    %c0_i32 = arith.constant 0 : i32
    %c0_i32_0 = arith.constant 0 : i32
    %c0_i32_1 = arith.constant 0 : i32
    return %c0_i32, %c0_i32_0 : i32, i32
  }
  func.func @transform_3(%arg0: i32) -> (i32, i32) {
    %c0_i32 = arith.constant 0 : i32
    %c0_i32_0 = arith.constant 0 : i32
    return %arg0, %c0_i32 : i32, i32
  }
}

</mosaic_0001>

<bundles_post_ra>
// kernel: tpu_custom_call.1
= control target key start
LH: loop header
LB: loop body
LE: loop exit
PB: predicated region body
PF: predicated region fallthrough
CT: control target
= control target key end

     0   :  { %8 = vsyncpa [#allocation3], 0  ;;  %s771_s0 = inlined_call_operand.hbm [shape: f32[256,256], index: 0, kind: input, shape index: {}]   ;;  %s772_s1 = inlined_call_operand.hbm [shape: f32[256,256], index: 1, kind: input, shape index: {}]   ;;  %s773_s2 = inlined_call_operand.vmem [shape: f32[1,256], index: 2, kind: input, shape index: {}]   ;;  %s774_s3 = inlined_call_operand.hbm [shape: f32[256,256], index: 3, kind: output, shape index: {}]  }
   0x1   :  { %9 = vsyncpa [#allocation6], 0 }
   0x2   :  { %10 = vsyncpa [#allocation4], 0  ;;  %s657_s12 = smov [#allocation2]  }
   0x3   :  { %s16_s13 = sshll.u32 %s657_s12, 4  ;;  %s17_s13 = int_to_ptr.vmem [resolvable:$true] %s16_s13 }
   0x4   :  { %s599_s14 = scalar_lea.vmem %s17_s13, 8192  ;;  %p604_p1 = scmp.lt.s32.totalorder %s17_s13, %s17_s13 }
   0x5   :  { %p600_p0 = scmp.ne.s32.totalorder %s17_s13, %s599_s14  ;;  %p605_p2 = scmp.lt.s32.totalorder %s599_s14, %s599_s14 }
   0x7   :  { %p606_p3 = por %p605_p2, %p604_p1 }
   0x9   :  { %p607_p4 = pnand %p606_p3, %p600_p0 }
   0xb   :  { %610 = shalt.err (!%p607_p4)
}
   0xc   :  { %s658_s15 = smov 256   ;;  %s659_s16 = smov 16  }
   0xd   :  { %22 = dma.hbm_to_vmem [thread:$0]  %s771_s0, 8192, %s17_s13, [#allocation3], %s658_s15, %s658_s15, %s659_s16  }
   0xe   :  { %s660_s19 = smov [#allocation5]  }
   0xf   :  { %s28_s20 = sshll.u32 %s660_s19, 4  ;;  %s29_s20 = int_to_ptr.vmem [resolvable:$true] %s28_s20 }
  0x10   :  { %s619_s21 = scalar_lea.vmem %s29_s20, 8192  ;;  %p624_p6 = scmp.lt.s32.totalorder %s29_s20, %s29_s20 }
  0x11   :  { %p620_p5 = scmp.ne.s32.totalorder %s29_s20, %s619_s21  ;;  %p625_p7 = scmp.lt.s32.totalorder %s619_s21, %s619_s21 }
  0x13   :  { %p626_p8 = por %p625_p7, %p624_p6 }
  0x15   :  { %p627_p9 = pnand %p626_p8, %p620_p5 }
  0x17   :  { %630 = shalt.err (!%p627_p9)
}
  0x18   :  { %34 = dma.hbm_to_vmem [thread:$0]  %s772_s1, 8192, %s29_s20, [#allocation6], %s658_s15, %s658_s15, %s659_s16  }
  0x19   :  { %651 = dma.done.wait [#allocation3], 8192  }
  0x1a   :  { %652 = vsyncadd [#allocation3], 4294959104 }
  0x1b   :  { %653 = dma.done.wait [#allocation6], 8192  }
  0x1c   :  { %654 = vsyncadd [#allocation6], 4294959104  ;;  %v138_v0 = vld [vmem:[#allocation5 + $0xf8] sm:$0xff]  ;;  %v137_v1 = vld [vmem:[#allocation5 + $0xf0] sm:$0xff] }
  0x1d   :  { %v136_v2 = vld [vmem:[#allocation5 + $0xe8] sm:$0xff]  ;;  %183 = vmatprep.subr.mxu0 %v138_v0  ;;  %522 = vmatprep.subr.mxu1 %v138_v0  ;;  %v135_v3 = vld [vmem:[#allocation5 + $0xe0] sm:$0xff]  ;;  %v134_v4 = vld [vmem:[#allocation5 + $0xd8] sm:$0xff] }
  0x1e   :  { %184 = vmatpush1.msra.mxu0 %v137_v1  ;;  %554 = vmatpush1.msra.mxu1 %v137_v1  ;;  %v133_v5 = vld [vmem:[#allocation5 + $0xd0] sm:$0xff]  ;;  %v132_v6 = vld [vmem:[#allocation5 + $0xc8] sm:$0xff]  ;;  %v131_v7 = vld [vmem:[#allocation5 + $0xc0] sm:$0xff] }
  0x1f   :  { %185 = vmatprep.subr.mxu0 %v136_v2  ;;  %523 = vmatprep.subr.mxu1 %v136_v2  ;;  %v130_v8 = vld [vmem:[#allocation5 + $0xb8] sm:$0xff]  ;;  %v129_v9 = vld [vmem:[#allocation5 + $0xb0] sm:$0xff]  ;;  %v128_v10 = vld [vmem:[#allocation5 + $0xa8] sm:$0xff] }
  0x20   :  { %186 = vmatpush1.msra.mxu0 %v135_v3  ;;  %555 = vmatpush1.msra.mxu1 %v135_v3  ;;  %v127_v11 = vld [vmem:[#allocation5 + $0xa0] sm:$0xff]  ;;  %v126_v12 = vld [vmem:[#allocation5 + $0x98] sm:$0xff]  ;;  %v125_v13 = vld [vmem:[#allocation5 + $0x90] sm:$0xff] }
  0x21   :  { %187 = vmatprep.subr.mxu0 %v134_v4  ;;  %524 = vmatprep.subr.mxu1 %v134_v4  ;;  %v124_v14 = vld [vmem:[#allocation5 + $0x88] sm:$0xff]  ;;  %v123_v15 = vld [vmem:[#allocation5 + $0x80] sm:$0xff]  ;;  %v122_v16 = vld [vmem:[#allocation5 + $0x78] sm:$0xff] }
  0x22   :  { %188 = vmatpush1.msra.mxu0 %v133_v5  ;;  %556 = vmatpush1.msra.mxu1 %v133_v5  ;;  %v121_v17 = vld [vmem:[#allocation5 + $0x70] sm:$0xff]  ;;  %v120_v18 = vld [vmem:[#allocation5 + $0x68] sm:$0xff]  ;;  %v119_v19 = vld [vmem:[#allocation5 + $0x60] sm:$0xff] }
  0x23   :  { %189 = vmatprep.subr.mxu0 %v132_v6  ;;  %525 = vmatprep.subr.mxu1 %v132_v6  ;;  %v118_v20 = vld [vmem:[#allocation5 + $0x58] sm:$0xff]  ;;  %v117_v21 = vld [vmem:[#allocation5 + $0x50] sm:$0xff]  ;;  %v116_v22 = vld [vmem:[#allocation5 + $0x48] sm:$0xff] }
  0x24   :  { %190 = vmatpush1.msra.mxu0 %v131_v7  ;;  %557 = vmatpush1.msra.mxu1 %v131_v7  ;;  %v115_v23 = vld [vmem:[#allocation5 + $0x40] sm:$0xff]  ;;  %v114_v24 = vld [vmem:[#allocation5 + $0x38] sm:$0xff]  ;;  %v113_v25 = vld [vmem:[#allocation5 + $0x30] sm:$0xff] }
  0x25   :  { %191 = vmatprep.subr.mxu0 %v130_v8  ;;  %526 = vmatprep.subr.mxu1 %v130_v8  ;;  %v112_v26 = vld [vmem:[#allocation5 + $0x28] sm:$0xff]  ;;  %v111_v27 = vld [vmem:[#allocation5 + $0x20] sm:$0xff]  ;;  %v110_v28 = vld [vmem:[#allocation5 + $0x18] sm:$0xff] }
  0x26   :  { %192 = vmatpush1.msra.mxu0 %v129_v9  ;;  %558 = vmatpush1.msra.mxu1 %v129_v9  ;;  %v109_v29 = vld [vmem:[#allocation5 + $0x10] sm:$0xff]  ;;  %v108_v30 = vld [vmem:[#allocation5 + $0x8] sm:$0xff]  ;;  %v107_v31 = vld [vmem:[#allocation5] sm:$0xff] }
  0x27   :  { %193 = vmatprep.subr.mxu0 %v128_v10  ;;  %527 = vmatprep.subr.mxu1 %v128_v10  ;;  %v170_v32 = vld [vmem:[#allocation5 + $0x1f8] sm:$0xff]  ;;  %v169_v33 = vld [vmem:[#allocation5 + $0x1f0] sm:$0xff]  ;;  %v168_v34 = vld [vmem:[#allocation5 + $0x1e8] sm:$0xff] }
  0x28   :  { %194 = vmatpush1.msra.mxu0 %v127_v11  ;;  %559 = vmatpush1.msra.mxu1 %v127_v11  ;;  %v167_v35 = vld [vmem:[#allocation5 + $0x1e0] sm:$0xff]  ;;  %v166_v36 = vld [vmem:[#allocation5 + $0x1d8] sm:$0xff]  ;;  %v165_v37 = vld [vmem:[#allocation5 + $0x1d0] sm:$0xff] }
  0x29   :  { %195 = vmatprep.subr.mxu0 %v126_v12  ;;  %528 = vmatprep.subr.mxu1 %v126_v12  ;;  %v164_v38 = vld [vmem:[#allocation5 + $0x1c8] sm:$0xff]  ;;  %v163_v39 = vld [vmem:[#allocation5 + $0x1c0] sm:$0xff]  ;;  %v162_v40 = vld [vmem:[#allocation5 + $0x1b8] sm:$0xff] }
  0x2a   :  { %196 = vmatpush1.msra.mxu0 %v125_v13  ;;  %560 = vmatpush1.msra.mxu1 %v125_v13  ;;  %v161_v41 = vld [vmem:[#allocation5 + $0x1b0] sm:$0xff]  ;;  %v160_v42 = vld [vmem:[#allocation5 + $0x1a8] sm:$0xff]  ;;  %v159_v43 = vld [vmem:[#allocation5 + $0x1a0] sm:$0xff] }
  0x2b   :  { %197 = vmatprep.subr.mxu0 %v124_v14  ;;  %529 = vmatprep.subr.mxu1 %v124_v14  ;;  %v158_v44 = vld [vmem:[#allocation5 + $0x198] sm:$0xff]  ;;  %v157_v45 = vld [vmem:[#allocation5 + $0x190] sm:$0xff]  ;;  %v156_v46 = vld [vmem:[#allocation5 + $0x188] sm:$0xff] }
  0x2c   :  { %198 = vmatpush1.msra.mxu0 %v123_v15  ;;  %561 = vmatpush1.msra.mxu1 %v123_v15  ;;  %v155_v47 = vld [vmem:[#allocation5 + $0x180] sm:$0xff]  ;;  %v154_v48 = vld [vmem:[#allocation5 + $0x178] sm:$0xff]  ;;  %v153_v49 = vld [vmem:[#allocation5 + $0x170] sm:$0xff] }
  0x2d   :  { %199 = vmatprep.subr.mxu0 %v122_v16  ;;  %530 = vmatprep.subr.mxu1 %v122_v16  ;;  %v152_v50 = vld [vmem:[#allocation5 + $0x168] sm:$0xff]  ;;  %v151_v51 = vld [vmem:[#allocation5 + $0x160] sm:$0xff]  ;;  %v150_v52 = vld [vmem:[#allocation5 + $0x158] sm:$0xff] }
  0x2e   :  { %200 = vmatpush1.msra.mxu0 %v121_v17  ;;  %562 = vmatpush1.msra.mxu1 %v121_v17  ;;  %v149_v53 = vld [vmem:[#allocation5 + $0x150] sm:$0xff]  ;;  %v148_v54 = vld [vmem:[#allocation5 + $0x148] sm:$0xff]  ;;  %v147_v55 = vld [vmem:[#allocation5 + $0x140] sm:$0xff] }
  0x2f   :  { %201 = vmatprep.subr.mxu0 %v120_v18  ;;  %531 = vmatprep.subr.mxu1 %v120_v18  ;;  %v146_v56 = vld [vmem:[#allocation5 + $0x138] sm:$0xff]  ;;  %v145_v57 = vld [vmem:[#allocation5 + $0x130] sm:$0xff]  ;;  %v144_v58 = vld [vmem:[#allocation5 + $0x128] sm:$0xff] }
  0x30   :  { %202 = vmatpush1.msra.mxu0 %v119_v19  ;;  %563 = vmatpush1.msra.mxu1 %v119_v19  ;;  %v143_v59 = vld [vmem:[#allocation5 + $0x120] sm:$0xff]  ;;  %v142_v60 = vld [vmem:[#allocation5 + $0x118] sm:$0xff]  ;;  %v141_v61 = vld [vmem:[#allocation5 + $0x110] sm:$0xff] }
  0x31   :  { %203 = vmatprep.subr.mxu0 %v118_v20  ;;  %532 = vmatprep.subr.mxu1 %v118_v20  ;;  %v140_v62 = vld [vmem:[#allocation5 + $0x108] sm:$0xff]  ;;  %v139_v63 = vld [vmem:[#allocation5 + $0x100] sm:$0xff]  ;;  %v46_v4 = vld [vmem:[#allocation2 + $0x18] sm:$0xff] }
  0x32   :  { %204 = vmatpush1.msra.mxu0 %v117_v21  ;;  %564 = vmatpush1.msra.mxu1 %v117_v21  ;;  %v44_v0 = vld [vmem:[#allocation2 + $0x8] sm:$0xff]  ;;  %v43_v2 = vld [vmem:[#allocation2] sm:$0xff]  ;;  %v78_v5 = vld [vmem:[#allocation2 + $0x118] sm:$0xff] }
  0x33   :  { %205 = vmatprep.subr.mxu0 %v116_v22  ;;  %533 = vmatprep.subr.mxu1 %v116_v22  ;;  %v76_v1 = vld [vmem:[#allocation2 + $0x108] sm:$0xff]  ;;  %v75_v3 = vld [vmem:[#allocation2 + $0x100] sm:$0xff]  ;;  %v45_v6 = vld [vmem:[#allocation2 + $0x10] sm:$0xff] }
  0x34   :  { %206 = vmatpush1.msra.mxu0 %v115_v23  ;;  %565 = vmatpush1.msra.mxu1 %v115_v23  ;;  %v77_v7 = vld [vmem:[#allocation2 + $0x110] sm:$0xff]  ;;  %v48_v8 = vld [vmem:[#allocation2 + $0x28] sm:$0xff]  ;;  %v47_v10 = vld [vmem:[#allocation2 + $0x20] sm:$0xff] }
  0x35   :  { %207 = vmatprep.subr.mxu0 %v114_v24  ;;  %534 = vmatprep.subr.mxu1 %v114_v24  ;;  %v80_v9 = vld [vmem:[#allocation2 + $0x128] sm:$0xff]  ;;  %v79_v11 = vld [vmem:[#allocation2 + $0x120] sm:$0xff]  ;;  %v50_v12 = vld [vmem:[#allocation2 + $0x38] sm:$0xff] }
  0x36   :  { %208 = vmatpush1.msra.mxu0 %v113_v25  ;;  %566 = vmatpush1.msra.mxu1 %v113_v25  ;;  %v82_v13 = vld [vmem:[#allocation2 + $0x138] sm:$0xff]  ;;  %v49_v14 = vld [vmem:[#allocation2 + $0x30] sm:$0xff]  ;;  %v52_v16 = vld [vmem:[#allocation2 + $0x48] sm:$0xff] }
  0x37   :  { %209 = vmatprep.subr.mxu0 %v112_v26  ;;  %535 = vmatprep.subr.mxu1 %v112_v26  ;;  %v81_v15 = vld [vmem:[#allocation2 + $0x130] sm:$0xff]  ;;  %v84_v17 = vld [vmem:[#allocation2 + $0x148] sm:$0xff]  ;;  %v51_v18 = vld [vmem:[#allocation2 + $0x40] sm:$0xff] }
  0x38   :  { %210 = vmatpush1.msra.mxu0 %v111_v27  ;;  %567 = vmatpush1.msra.mxu1 %v111_v27  ;;  %v83_v19 = vld [vmem:[#allocation2 + $0x140] sm:$0xff]  ;;  %v54_v20 = vld [vmem:[#allocation2 + $0x58] sm:$0xff]  ;;  %v53_v22 = vld [vmem:[#allocation2 + $0x50] sm:$0xff] }
  0x39   :  { %211 = vmatprep.subr.mxu0 %v110_v28  ;;  %536 = vmatprep.subr.mxu1 %v110_v28  ;;  %v86_v21 = vld [vmem:[#allocation2 + $0x158] sm:$0xff]  ;;  %v85_v23 = vld [vmem:[#allocation2 + $0x150] sm:$0xff]  ;;  %v56_v24 = vld [vmem:[#allocation2 + $0x68] sm:$0xff] }
  0x3a   :  { %212 = vmatpush1.msra.mxu0 %v109_v29  ;;  %568 = vmatpush1.msra.mxu1 %v109_v29  ;;  %v88_v25 = vld [vmem:[#allocation2 + $0x168] sm:$0xff]  ;;  %v55_v26 = vld [vmem:[#allocation2 + $0x60] sm:$0xff]  ;;  %v58_v28 = vld [vmem:[#allocation2 + $0x78] sm:$0xff] }
  0x3b   :  { %213 = vmatprep.subr.mxu0 %v108_v30  ;;  %537 = vmatprep.subr.mxu1 %v108_v30  ;;  %v87_v27 = vld [vmem:[#allocation2 + $0x160] sm:$0xff]  ;;  %v90_v29 = vld [vmem:[#allocation2 + $0x178] sm:$0xff]  ;;  %v57_v30 = vld [vmem:[#allocation2 + $0x70] sm:$0xff] }
  0x3c   :  { %214 = vmatpush1.msra.mxu0 %v107_v31  ;;  %569 = vmatpush1.msra.mxu1 %v107_v31  ;;  %v89_v31 = vld [vmem:[#allocation2 + $0x170] sm:$0xff] }
  0x3d   :  { %215 = vmatprep.subr.mxu0 %v170_v32  ;;  %538 = vmatprep.subr.mxu1 %v170_v32  ;;  %v60_v32 = vld [vmem:[#allocation2 + $0x88] sm:$0xff] }
  0x3e   :  { %216 = vmatpush2.msra.mxu0 %v169_v33  ;;  %570 = vmatpush2.msra.mxu1 %v169_v33  ;;  %v92_v33 = vld [vmem:[#allocation2 + $0x188] sm:$0xff] }
  0x3f   :  { %217 = vmatprep.subr.mxu0 %v168_v34  ;;  %539 = vmatprep.subr.mxu1 %v168_v34  ;;  %v59_v34 = vld [vmem:[#allocation2 + $0x80] sm:$0xff] }
  0x40   :  { %218 = vmatpush2.msra.mxu0 %v167_v35  ;;  %571 = vmatpush2.msra.mxu1 %v167_v35  ;;  %v91_v35 = vld [vmem:[#allocation2 + $0x180] sm:$0xff] }
  0x41   :  { %219 = vmatprep.subr.mxu0 %v166_v36  ;;  %540 = vmatprep.subr.mxu1 %v166_v36  ;;  %v62_v36 = vld [vmem:[#allocation2 + $0x98] sm:$0xff] }
  0x42   :  { %220 = vmatpush2.msra.mxu0 %v165_v37  ;;  %572 = vmatpush2.msra.mxu1 %v165_v37  ;;  %v94_v37 = vld [vmem:[#allocation2 + $0x198] sm:$0xff] }
  0x43   :  { %221 = vmatprep.subr.mxu0 %v164_v38  ;;  %541 = vmatprep.subr.mxu1 %v164_v38  ;;  %v61_v38 = vld [vmem:[#allocation2 + $0x90] sm:$0xff] }
  0x44   :  { %222 = vmatpush2.msra.mxu0 %v163_v39  ;;  %573 = vmatpush2.msra.mxu1 %v163_v39  ;;  %v93_v39 = vld [vmem:[#allocation2 + $0x190] sm:$0xff] }
  0x45   :  { %223 = vmatprep.subr.mxu0 %v162_v40  ;;  %542 = vmatprep.subr.mxu1 %v162_v40  ;;  %v64_v40 = vld [vmem:[#allocation2 + $0xa8] sm:$0xff] }
  0x46   :  { %224 = vmatpush2.msra.mxu0 %v161_v41  ;;  %574 = vmatpush2.msra.mxu1 %v161_v41  ;;  %v96_v41 = vld [vmem:[#allocation2 + $0x1a8] sm:$0xff] }
  0x47   :  { %225 = vmatprep.subr.mxu0 %v160_v42  ;;  %543 = vmatprep.subr.mxu1 %v160_v42  ;;  %v63_v42 = vld [vmem:[#allocation2 + $0xa0] sm:$0xff] }
  0x48   :  { %226 = vmatpush2.msra.mxu0 %v159_v43  ;;  %575 = vmatpush2.msra.mxu1 %v159_v43  ;;  %v95_v43 = vld [vmem:[#allocation2 + $0x1a0] sm:$0xff] }
  0x49   :  { %227 = vmatprep.subr.mxu0 %v158_v44  ;;  %544 = vmatprep.subr.mxu1 %v158_v44  ;;  %v66_v44 = vld [vmem:[#allocation2 + $0xb8] sm:$0xff] }
  0x4a   :  { %228 = vmatpush2.msra.mxu0 %v157_v45  ;;  %576 = vmatpush2.msra.mxu1 %v157_v45  ;;  %v98_v45 = vld [vmem:[#allocation2 + $0x1b8] sm:$0xff] }
  0x4b   :  { %229 = vmatprep.subr.mxu0 %v156_v46  ;;  %545 = vmatprep.subr.mxu1 %v156_v46  ;;  %v65_v46 = vld [vmem:[#allocation2 + $0xb0] sm:$0xff] }
  0x4c   :  { %230 = vmatpush2.msra.mxu0 %v155_v47  ;;  %577 = vmatpush2.msra.mxu1 %v155_v47  ;;  %v97_v47 = vld [vmem:[#allocation2 + $0x1b0] sm:$0xff] }
  0x4d   :  { %231 = vmatprep.subr.mxu0 %v154_v48  ;;  %546 = vmatprep.subr.mxu1 %v154_v48  ;;  %v68_v48 = vld [vmem:[#allocation2 + $0xc8] sm:$0xff] }
  0x4e   :  { %232 = vmatpush2.msra.mxu0 %v153_v49  ;;  %578 = vmatpush2.msra.mxu1 %v153_v49  ;;  %v100_v49 = vld [vmem:[#allocation2 + $0x1c8] sm:$0xff] }
  0x4f   :  { %233 = vmatprep.subr.mxu0 %v152_v50  ;;  %547 = vmatprep.subr.mxu1 %v152_v50  ;;  %v67_v50 = vld [vmem:[#allocation2 + $0xc0] sm:$0xff] }
  0x50   :  { %234 = vmatpush2.msra.mxu0 %v151_v51  ;;  %579 = vmatpush2.msra.mxu1 %v151_v51  ;;  %v99_v51 = vld [vmem:[#allocation2 + $0x1c0] sm:$0xff] }
  0x51   :  { %235 = vmatprep.subr.mxu0 %v150_v52  ;;  %548 = vmatprep.subr.mxu1 %v150_v52  ;;  %v70_v52 = vld [vmem:[#allocation2 + $0xd8] sm:$0xff] }
  0x52   :  { %236 = vmatpush2.msra.mxu0 %v149_v53  ;;  %580 = vmatpush2.msra.mxu1 %v149_v53  ;;  %v102_v53 = vld [vmem:[#allocation2 + $0x1d8] sm:$0xff] }
  0x53   :  { %237 = vmatprep.subr.mxu0 %v148_v54  ;;  %549 = vmatprep.subr.mxu1 %v148_v54  ;;  %v69_v54 = vld [vmem:[#allocation2 + $0xd0] sm:$0xff] }
  0x54   :  { %238 = vmatpush2.msra.mxu0 %v147_v55  ;;  %581 = vmatpush2.msra.mxu1 %v147_v55  ;;  %v101_v55 = vld [vmem:[#allocation2 + $0x1d0] sm:$0xff] }
  0x55   :  { %239 = vmatprep.subr.mxu0 %v146_v56  ;;  %550 = vmatprep.subr.mxu1 %v146_v56  ;;  %v72_v56 = vld [vmem:[#allocation2 + $0xe8] sm:$0xff] }
  0x56   :  { %240 = vmatpush2.msra.mxu0 %v145_v57  ;;  %582 = vmatpush2.msra.mxu1 %v145_v57  ;;  %v104_v57 = vld [vmem:[#allocation2 + $0x1e8] sm:$0xff] }
  0x57   :  { %241 = vmatprep.subr.mxu0 %v144_v58  ;;  %551 = vmatprep.subr.mxu1 %v144_v58  ;;  %v71_v58 = vld [vmem:[#allocation2 + $0xe0] sm:$0xff] }
  0x58   :  { %242 = vmatpush2.msra.mxu0 %v143_v59  ;;  %583 = vmatpush2.msra.mxu1 %v143_v59  ;;  %v103_v59 = vld [vmem:[#allocation2 + $0x1e0] sm:$0xff] }
  0x59   :  { %243 = vmatprep.subr.mxu0 %v142_v60  ;;  %552 = vmatprep.subr.mxu1 %v142_v60  ;;  %v74_v60 = vld [vmem:[#allocation2 + $0xf8] sm:$0xff] }
  0x5a   :  { %244 = vmatpush2.msra.mxu0 %v141_v61  ;;  %584 = vmatpush2.msra.mxu1 %v141_v61  ;;  %v106_v61 = vld [vmem:[#allocation2 + $0x1f8] sm:$0xff] }
  0x5b   :  { %245 = vmatprep.subr.mxu0 %v140_v62  ;;  %553 = vmatprep.subr.mxu1 %v140_v62  ;;  %v73_v62 = vld [vmem:[#allocation2 + $0xf0] sm:$0xff] }
  0x5c   :  { %246 = vmatpush2.msra.mxu0 %v139_v63  ;;  %585 = vmatpush2.msra.mxu1 %v139_v63  ;;  %v105_v63 = vld [vmem:[#allocation2 + $0x1f0] sm:$0xff] }
  0x5d   :  { %247 = vmatprep.mubr.f32.mxu0 %v44_v0  ;;  %343 = vmatprep.mubr.f32.mxu1 %v76_v1  ;;  %v173_v0 = vlaneseq }
  0x5e   :  { %248 = vmatmul.mubr.f32.vlgmr.msra.gmra.mxu0 %v43_v2  ;;  %344 = vmatmul.mubr.f32.vlgmr.msra.gmra.mxu1 %v75_v3  ;;  %v171_v3 = vld [vmem:[%s773_s2] sm:$0x3]  ;;  %s661_s2 = smov [#allocation7]  }
  0x5f   :  { %253 = vmatprep.mubr.f32.mxu0 %v46_v4  ;;  %349 = vmatprep.mubr.f32.mxu1 %v78_v5  ;;  %v174_v1 = vshrl.u32 %v173_v0, 7  ;;  %s509_s24 = sshll.u32 %s661_s2, 4  ;;  %s510_s24 = int_to_ptr.vmem [resolvable:$true] %s509_s24 }
  0x60   :  { %s631_s25 = scalar_lea.vmem %s510_s24, 8192  ;;  %p636_p11 = scmp.lt.s32.totalorder %s510_s24, %s510_s24 }
  0x61   :  { %v175_v2 = vsub.s32 0, %v174_v1  ;;  %v179_v4 = vsub.s32 1, %v174_v1  ;;  %p632_p10 = scmp.ne.s32.totalorder %s510_s24, %s631_s25  ;;  %p637_p12 = scmp.lt.s32.totalorder %s631_s25, %s631_s25 }
  0x62   :  { %254 = vmatmul.mubr.f32.gmra.mxu0 %v45_v6  ;;  %350 = vmatmul.mubr.f32.gmra.mxu1 %v77_v7 }
  0x63   :  { %259 = vmatprep.mubr.f32.mxu0 %v48_v8  ;;  %355 = vmatprep.mubr.f32.mxu1 %v80_v9  ;;  %v697_v5 = vrot.slane %v171_v3, %v175_v2  ;;  %v699_v6 = vrot.slane %v171_v3, %v179_v4  ;;  %p638_p13 = por %p637_p12, %p636_p11 }
  0x65   :  { %p639_p0 = pnand %p638_p13, %p632_p10 }
  0x66   :  { %260 = vmatmul.mubr.f32.gmra.mxu0 %v47_v10  ;;  %356 = vmatmul.mubr.f32.gmra.mxu1 %v79_v11 }
  0x67   :  { %265 = vmatprep.mubr.f32.mxu0 %v50_v12  ;;  %361 = vmatprep.mubr.f32.mxu1 %v82_v13 }
  0x6a   :  { %266 = vmatmul.mubr.f32.gmra.mxu0 %v49_v14  ;;  %362 = vmatmul.mubr.f32.gmra.mxu1 %v81_v15 }
  0x6b   :  { %271 = vmatprep.mubr.f32.mxu0 %v52_v16  ;;  %367 = vmatprep.mubr.f32.mxu1 %v84_v17 }
  0x6e   :  { %272 = vmatmul.mubr.f32.gmra.mxu0 %v51_v18  ;;  %368 = vmatmul.mubr.f32.gmra.mxu1 %v83_v19 }
  0x6f   :  { %277 = vmatprep.mubr.f32.mxu0 %v54_v20  ;;  %373 = vmatprep.mubr.f32.mxu1 %v86_v21 }
  0x72   :  { %278 = vmatmul.mubr.f32.gmra.mxu0 %v53_v22  ;;  %374 = vmatmul.mubr.f32.gmra.mxu1 %v85_v23 }
  0x73   :  { %283 = vmatprep.mubr.f32.mxu0 %v56_v24  ;;  %379 = vmatprep.mubr.f32.mxu1 %v88_v25 }
  0x76   :  { %284 = vmatmul.mubr.f32.gmra.mxu0 %v55_v26  ;;  %380 = vmatmul.mubr.f32.gmra.mxu1 %v87_v27 }
  0x77   :  { %289 = vmatprep.mubr.f32.mxu0 %v58_v28  ;;  %385 = vmatprep.mubr.f32.mxu1 %v90_v29 }
  0x7a   :  { %290 = vmatmul.mubr.f32.gmra.mxu0 %v57_v30  ;;  %386 = vmatmul.mubr.f32.gmra.mxu1 %v89_v31 }
  0x7b   :  { %295 = vmatprep.mubr.f32.mxu0 %v60_v32  ;;  %391 = vmatprep.mubr.f32.mxu1 %v92_v33 }
  0x7e   :  { %296 = vmatmul.mubr.f32.gmra.mxu0 %v59_v34  ;;  %392 = vmatmul.mubr.f32.gmra.mxu1 %v91_v35 }
  0x7f   :  { %301 = vmatprep.mubr.f32.mxu0 %v62_v36  ;;  %397 = vmatprep.mubr.f32.mxu1 %v94_v37 }
  0x82   :  { %302 = vmatmul.mubr.f32.gmra.mxu0 %v61_v38  ;;  %398 = vmatmul.mubr.f32.gmra.mxu1 %v93_v39 }
  0x83   :  { %307 = vmatprep.mubr.f32.mxu0 %v64_v40  ;;  %403 = vmatprep.mubr.f32.mxu1 %v96_v41 }
  0x86   :  { %308 = vmatmul.mubr.f32.gmra.mxu0 %v63_v42  ;;  %404 = vmatmul.mubr.f32.gmra.mxu1 %v95_v43 }
  0x87   :  { %313 = vmatprep.mubr.f32.mxu0 %v66_v44  ;;  %409 = vmatprep.mubr.f32.mxu1 %v98_v45 }
  0x8a   :  { %314 = vmatmul.mubr.f32.gmra.mxu0 %v65_v46  ;;  %410 = vmatmul.mubr.f32.gmra.mxu1 %v97_v47 }
  0x8b   :  { %319 = vmatprep.mubr.f32.mxu0 %v68_v48  ;;  %415 = vmatprep.mubr.f32.mxu1 %v100_v49 }
  0x8e   :  { %320 = vmatmul.mubr.f32.gmra.mxu0 %v67_v50  ;;  %416 = vmatmul.mubr.f32.gmra.mxu1 %v99_v51 }
  0x8f   :  { %325 = vmatprep.mubr.f32.mxu0 %v70_v52  ;;  %421 = vmatprep.mubr.f32.mxu1 %v102_v53 }
  0x92   :  { %326 = vmatmul.mubr.f32.gmra.mxu0 %v69_v54  ;;  %422 = vmatmul.mubr.f32.gmra.mxu1 %v101_v55 }
  0x93   :  { %331 = vmatprep.mubr.f32.mxu0 %v72_v56  ;;  %427 = vmatprep.mubr.f32.mxu1 %v104_v57 }
  0x96   :  { %332 = vmatmul.mubr.f32.gmra.mxu0 %v71_v58  ;;  %428 = vmatmul.mubr.f32.gmra.mxu1 %v103_v59 }
  0x97   :  { %337 = vmatprep.mubr.f32.mxu0 %v74_v60  ;;  %433 = vmatprep.mubr.f32.mxu1 %v106_v61 }
  0x9a   :  { %338 = vmatmul.mubr.f32.gmra.mxu0 %v73_v62  ;;  %434 = vmatmul.mubr.f32.gmra.mxu1 %v105_v63 }
 0x11e   :  { %v249_v7 = vpop.f32.mrf.mxu0  ;;  %v345_v8 = vpop.f32.mrf.mxu1 }
 0x11f   :  { %v250_v9 = vadd.f32 %v249_v7, %v697_v5  ;;  %v346_v10 = vadd.f32 %v345_v8, %v697_v5 }
 0x120   :  { %v251_v11 = vpop.f32.mrf.mxu0  ;;  %v347_v12 = vpop.f32.mrf.mxu1 }
 0x121   :  { %440 = vst [vmem:[#allocation7] sm:$0xff] %v250_v9  ;;  %472 = vst [vmem:[#allocation7 + $0x100] sm:$0xff] %v346_v10  ;;  %v252_v13 = vadd.f32 %v251_v11, %v699_v6  ;;  %v348_v14 = vadd.f32 %v347_v12, %v699_v6 }
 0x122   :  { %v255_v15 = vpop.f32.mrf.mxu0  ;;  %v351_v16 = vpop.f32.mrf.mxu1 }
 0x123   :  { %441 = vst [vmem:[#allocation7 + $0x8] sm:$0xff] %v252_v13  ;;  %473 = vst [vmem:[#allocation7 + $0x108] sm:$0xff] %v348_v14  ;;  %v256_v17 = vadd.f32 %v255_v15, %v697_v5  ;;  %v352_v18 = vadd.f32 %v351_v16, %v697_v5 }
 0x124   :  { %v257_v19 = vpop.f32.mrf.mxu0  ;;  %v353_v20 = vpop.f32.mrf.mxu1 }
 0x125   :  { %442 = vst [vmem:[#allocation7 + $0x10] sm:$0xff] %v256_v17  ;;  %474 = vst [vmem:[#allocation7 + $0x110] sm:$0xff] %v352_v18  ;;  %v258_v21 = vadd.f32 %v257_v19, %v699_v6  ;;  %v354_v22 = vadd.f32 %v353_v20, %v699_v6 }
 0x126   :  { %v261_v23 = vpop.f32.mrf.mxu0  ;;  %v357_v24 = vpop.f32.mrf.mxu1 }
 0x127   :  { %443 = vst [vmem:[#allocation7 + $0x18] sm:$0xff] %v258_v21  ;;  %475 = vst [vmem:[#allocation7 + $0x118] sm:$0xff] %v354_v22  ;;  %v262_v25 = vadd.f32 %v261_v23, %v697_v5  ;;  %v358_v26 = vadd.f32 %v357_v24, %v697_v5 }
 0x128   :  { %v263_v27 = vpop.f32.mrf.mxu0  ;;  %v359_v28 = vpop.f32.mrf.mxu1 }
 0x129   :  { %444 = vst [vmem:[#allocation7 + $0x20] sm:$0xff] %v262_v25  ;;  %476 = vst [vmem:[#allocation7 + $0x120] sm:$0xff] %v358_v26  ;;  %v264_v29 = vadd.f32 %v263_v27, %v699_v6  ;;  %v360_v30 = vadd.f32 %v359_v28, %v699_v6 }
 0x12a   :  { %v267_v31 = vpop.f32.mrf.mxu0  ;;  %v363_v32 = vpop.f32.mrf.mxu1 }
 0x12b   :  { %445 = vst [vmem:[#allocation7 + $0x28] sm:$0xff] %v264_v29  ;;  %477 = vst [vmem:[#allocation7 + $0x128] sm:$0xff] %v360_v30  ;;  %v268_v33 = vadd.f32 %v267_v31, %v697_v5  ;;  %v364_v34 = vadd.f32 %v363_v32, %v697_v5 }
 0x12c   :  { %v269_v35 = vpop.f32.mrf.mxu0  ;;  %v365_v36 = vpop.f32.mrf.mxu1 }
 0x12d   :  { %446 = vst [vmem:[#allocation7 + $0x30] sm:$0xff] %v268_v33  ;;  %478 = vst [vmem:[#allocation7 + $0x130] sm:$0xff] %v364_v34  ;;  %v270_v37 = vadd.f32 %v269_v35, %v699_v6  ;;  %v366_v38 = vadd.f32 %v365_v36, %v699_v6 }
 0x12e   :  { %v273_v39 = vpop.f32.mrf.mxu0  ;;  %v369_v40 = vpop.f32.mrf.mxu1 }
 0x12f   :  { %447 = vst [vmem:[#allocation7 + $0x38] sm:$0xff] %v270_v37  ;;  %479 = vst [vmem:[#allocation7 + $0x138] sm:$0xff] %v366_v38  ;;  %v274_v41 = vadd.f32 %v273_v39, %v697_v5  ;;  %v370_v42 = vadd.f32 %v369_v40, %v697_v5 }
 0x130   :  { %v275_v43 = vpop.f32.mrf.mxu0  ;;  %v371_v44 = vpop.f32.mrf.mxu1 }
 0x131   :  { %448 = vst [vmem:[#allocation7 + $0x40] sm:$0xff] %v274_v41  ;;  %480 = vst [vmem:[#allocation7 + $0x140] sm:$0xff] %v370_v42  ;;  %v276_v45 = vadd.f32 %v275_v43, %v699_v6  ;;  %v372_v46 = vadd.f32 %v371_v44, %v699_v6 }
 0x132   :  { %v279_v47 = vpop.f32.mrf.mxu0  ;;  %v375_v48 = vpop.f32.mrf.mxu1 }
 0x133   :  { %449 = vst [vmem:[#allocation7 + $0x48] sm:$0xff] %v276_v45  ;;  %481 = vst [vmem:[#allocation7 + $0x148] sm:$0xff] %v372_v46  ;;  %v280_v49 = vadd.f32 %v279_v47, %v697_v5  ;;  %v376_v50 = vadd.f32 %v375_v48, %v697_v5 }
 0x134   :  { %v281_v51 = vpop.f32.mrf.mxu0  ;;  %v377_v52 = vpop.f32.mrf.mxu1 }
 0x135   :  { %450 = vst [vmem:[#allocation7 + $0x50] sm:$0xff] %v280_v49  ;;  %482 = vst [vmem:[#allocation7 + $0x150] sm:$0xff] %v376_v50  ;;  %v282_v53 = vadd.f32 %v281_v51, %v699_v6  ;;  %v378_v54 = vadd.f32 %v377_v52, %v699_v6 }
 0x136   :  { %v285_v55 = vpop.f32.mrf.mxu0  ;;  %v381_v56 = vpop.f32.mrf.mxu1 }
 0x137   :  { %451 = vst [vmem:[#allocation7 + $0x58] sm:$0xff] %v282_v53  ;;  %483 = vst [vmem:[#allocation7 + $0x158] sm:$0xff] %v378_v54  ;;  %v286_v57 = vadd.f32 %v285_v55, %v697_v5  ;;  %v382_v58 = vadd.f32 %v381_v56, %v697_v5 }
 0x138   :  { %v287_v59 = vpop.f32.mrf.mxu0  ;;  %v383_v60 = vpop.f32.mrf.mxu1 }
 0x139   :  { %452 = vst [vmem:[#allocation7 + $0x60] sm:$0xff] %v286_v57  ;;  %484 = vst [vmem:[#allocation7 + $0x160] sm:$0xff] %v382_v58  ;;  %v288_v61 = vadd.f32 %v287_v59, %v699_v6  ;;  %v384_v62 = vadd.f32 %v383_v60, %v699_v6 }
 0x13a   :  { %v291_v63 = vpop.f32.mrf.mxu0  ;;  %v387_v0 = vpop.f32.mrf.mxu1 }
 0x13b   :  { %453 = vst [vmem:[#allocation7 + $0x68] sm:$0xff] %v288_v61  ;;  %485 = vst [vmem:[#allocation7 + $0x168] sm:$0xff] %v384_v62  ;;  %v292_v1 = vadd.f32 %v291_v63, %v697_v5  ;;  %v388_v2 = vadd.f32 %v387_v0, %v697_v5 }
 0x13c   :  { %v293_v3 = vpop.f32.mrf.mxu0  ;;  %v389_v4 = vpop.f32.mrf.mxu1 }
 0x13d   :  { %454 = vst [vmem:[#allocation7 + $0x70] sm:$0xff] %v292_v1  ;;  %486 = vst [vmem:[#allocation7 + $0x170] sm:$0xff] %v388_v2  ;;  %v294_v7 = vadd.f32 %v293_v3, %v699_v6  ;;  %v390_v8 = vadd.f32 %v389_v4, %v699_v6 }
 0x13e   :  { %v297_v9 = vpop.f32.mrf.mxu0  ;;  %v393_v10 = vpop.f32.mrf.mxu1 }
 0x13f   :  { %455 = vst [vmem:[#allocation7 + $0x78] sm:$0xff] %v294_v7  ;;  %487 = vst [vmem:[#allocation7 + $0x178] sm:$0xff] %v390_v8  ;;  %v298_v11 = vadd.f32 %v297_v9, %v697_v5  ;;  %v394_v12 = vadd.f32 %v393_v10, %v697_v5 }
 0x140   :  { %v299_v13 = vpop.f32.mrf.mxu0  ;;  %v395_v14 = vpop.f32.mrf.mxu1 }
 0x141   :  { %456 = vst [vmem:[#allocation7 + $0x80] sm:$0xff] %v298_v11  ;;  %488 = vst [vmem:[#allocation7 + $0x180] sm:$0xff] %v394_v12  ;;  %v300_v15 = vadd.f32 %v299_v13, %v699_v6  ;;  %v396_v16 = vadd.f32 %v395_v14, %v699_v6 }
 0x142   :  { %v303_v17 = vpop.f32.mrf.mxu0  ;;  %v399_v18 = vpop.f32.mrf.mxu1 }
 0x143   :  { %457 = vst [vmem:[#allocation7 + $0x88] sm:$0xff] %v300_v15  ;;  %489 = vst [vmem:[#allocation7 + $0x188] sm:$0xff] %v396_v16  ;;  %v304_v19 = vadd.f32 %v303_v17, %v697_v5  ;;  %v400_v20 = vadd.f32 %v399_v18, %v697_v5 }
 0x144   :  { %v305_v21 = vpop.f32.mrf.mxu0  ;;  %v401_v22 = vpop.f32.mrf.mxu1 }
 0x145   :  { %458 = vst [vmem:[#allocation7 + $0x90] sm:$0xff] %v304_v19  ;;  %490 = vst [vmem:[#allocation7 + $0x190] sm:$0xff] %v400_v20  ;;  %v306_v23 = vadd.f32 %v305_v21, %v699_v6  ;;  %v402_v24 = vadd.f32 %v401_v22, %v699_v6 }
 0x146   :  { %v309_v25 = vpop.f32.mrf.mxu0  ;;  %v405_v26 = vpop.f32.mrf.mxu1 }
 0x147   :  { %459 = vst [vmem:[#allocation7 + $0x98] sm:$0xff] %v306_v23  ;;  %491 = vst [vmem:[#allocation7 + $0x198] sm:$0xff] %v402_v24  ;;  %v310_v27 = vadd.f32 %v309_v25, %v697_v5  ;;  %v406_v28 = vadd.f32 %v405_v26, %v697_v5 }
 0x148   :  { %v311_v29 = vpop.f32.mrf.mxu0  ;;  %v407_v30 = vpop.f32.mrf.mxu1 }
 0x149   :  { %460 = vst [vmem:[#allocation7 + $0xa0] sm:$0xff] %v310_v27  ;;  %492 = vst [vmem:[#allocation7 + $0x1a0] sm:$0xff] %v406_v28  ;;  %v312_v31 = vadd.f32 %v311_v29, %v699_v6  ;;  %v408_v32 = vadd.f32 %v407_v30, %v699_v6 }
 0x14a   :  { %v315_v33 = vpop.f32.mrf.mxu0  ;;  %v411_v34 = vpop.f32.mrf.mxu1 }
 0x14b   :  { %461 = vst [vmem:[#allocation7 + $0xa8] sm:$0xff] %v312_v31  ;;  %493 = vst [vmem:[#allocation7 + $0x1a8] sm:$0xff] %v408_v32  ;;  %v316_v35 = vadd.f32 %v315_v33, %v697_v5  ;;  %v412_v36 = vadd.f32 %v411_v34, %v697_v5 }
 0x14c   :  { %v317_v37 = vpop.f32.mrf.mxu0  ;;  %v413_v38 = vpop.f32.mrf.mxu1 }
 0x14d   :  { %462 = vst [vmem:[#allocation7 + $0xb0] sm:$0xff] %v316_v35  ;;  %494 = vst [vmem:[#allocation7 + $0x1b0] sm:$0xff] %v412_v36  ;;  %v318_v39 = vadd.f32 %v317_v37, %v699_v6  ;;  %v414_v40 = vadd.f32 %v413_v38, %v699_v6 }
 0x14e   :  { %v321_v41 = vpop.f32.mrf.mxu0  ;;  %v417_v42 = vpop.f32.mrf.mxu1 }
 0x14f   :  { %463 = vst [vmem:[#allocation7 + $0xb8] sm:$0xff] %v318_v39  ;;  %495 = vst [vmem:[#allocation7 + $0x1b8] sm:$0xff] %v414_v40  ;;  %v322_v43 = vadd.f32 %v321_v41, %v697_v5  ;;  %v418_v44 = vadd.f32 %v417_v42, %v697_v5 }
 0x150   :  { %v323_v45 = vpop.f32.mrf.mxu0  ;;  %v419_v46 = vpop.f32.mrf.mxu1 }
 0x151   :  { %464 = vst [vmem:[#allocation7 + $0xc0] sm:$0xff] %v322_v43  ;;  %496 = vst [vmem:[#allocation7 + $0x1c0] sm:$0xff] %v418_v44  ;;  %v324_v47 = vadd.f32 %v323_v45, %v699_v6  ;;  %v420_v48 = vadd.f32 %v419_v46, %v699_v6 }
 0x152   :  { %v327_v49 = vpop.f32.mrf.mxu0  ;;  %v423_v50 = vpop.f32.mrf.mxu1 }
 0x153   :  { %465 = vst [vmem:[#allocation7 + $0xc8] sm:$0xff] %v324_v47  ;;  %497 = vst [vmem:[#allocation7 + $0x1c8] sm:$0xff] %v420_v48  ;;  %v328_v51 = vadd.f32 %v327_v49, %v697_v5  ;;  %v424_v52 = vadd.f32 %v423_v50, %v697_v5 }
 0x154   :  { %v329_v53 = vpop.f32.mrf.mxu0  ;;  %v425_v54 = vpop.f32.mrf.mxu1 }
 0x155   :  { %466 = vst [vmem:[#allocation7 + $0xd0] sm:$0xff] %v328_v51  ;;  %498 = vst [vmem:[#allocation7 + $0x1d0] sm:$0xff] %v424_v52  ;;  %v330_v55 = vadd.f32 %v329_v53, %v699_v6  ;;  %v426_v56 = vadd.f32 %v425_v54, %v699_v6 }
 0x156   :  { %v333_v57 = vpop.f32.mrf.mxu0  ;;  %v429_v58 = vpop.f32.mrf.mxu1 }
 0x157   :  { %467 = vst [vmem:[#allocation7 + $0xd8] sm:$0xff] %v330_v55  ;;  %499 = vst [vmem:[#allocation7 + $0x1d8] sm:$0xff] %v426_v56  ;;  %v334_v59 = vadd.f32 %v333_v57, %v697_v5  ;;  %v430_v60 = vadd.f32 %v429_v58, %v697_v5 }
 0x158   :  { %v335_v61 = vpop.f32.mrf.mxu0  ;;  %v431_v62 = vpop.f32.mrf.mxu1 }
 0x159   :  { %468 = vst [vmem:[#allocation7 + $0xe0] sm:$0xff] %v334_v59  ;;  %500 = vst [vmem:[#allocation7 + $0x1e0] sm:$0xff] %v430_v60  ;;  %v336_v63 = vadd.f32 %v335_v61, %v699_v6  ;;  %v432_v0 = vadd.f32 %v431_v62, %v699_v6 }
 0x15a   :  { %v339_v1 = vpop.f32.mrf.mxu0  ;;  %v435_v2 = vpop.f32.mrf.mxu1 }
 0x15b   :  { %469 = vst [vmem:[#allocation7 + $0xe8] sm:$0xff] %v336_v63  ;;  %501 = vst [vmem:[#allocation7 + $0x1e8] sm:$0xff] %v432_v0  ;;  %v340_v3 = vadd.f32 %v339_v1, %v697_v5  ;;  %v436_v4 = vadd.f32 %v435_v2, %v697_v5 }
 0x15c   :  { %v341_v7 = vpop.f32.mrf.mxu0  ;;  %v437_v8 = vpop.f32.mrf.mxu1 }
 0x15d   :  { %470 = vst [vmem:[#allocation7 + $0xf0] sm:$0xff] %v340_v3  ;;  %502 = vst [vmem:[#allocation7 + $0x1f0] sm:$0xff] %v436_v4  ;;  %v342_v9 = vadd.f32 %v341_v7, %v699_v6  ;;  %v438_v10 = vadd.f32 %v437_v8, %v699_v6 }
 0x15f   :  { %471 = vst [vmem:[#allocation7 + $0xf8] sm:$0xff] %v342_v9  ;;  %503 = vst [vmem:[#allocation7 + $0x1f8] sm:$0xff] %v438_v10 }
 0x160   :  { %642 = shalt.err (!%p639_p0)
}
 0x161   :  { %515 = dma.vmem_to_hbm [thread:$0]  %s510_s24, 8192, %s774_s3, [#allocation4], %s658_s15, %s658_s15, %s659_s16  }
 0x162   :  { %655 = dma.done.wait [#allocation4], 8192  }
 0x163   :  { %656 = vsyncadd [#allocation4], 4294959104 }
 0x164   :  { %519 = vsyncpa [#allocation3], 1 }
 0x165   :  { %520 = vsyncpa [#allocation6], 1 }
 0x166   :  { %521 = vsyncpa [#allocation4], 1 }

</bundles_post_ra>
